<compile_context>
chip_gen: v6e
topology: v6e:2x2x1
jax: 0.10.0
libtpu: 0.0.40
codegen_flags: <defaults>
</compile_context>

<pallas_src>
import functools
import math

import jax
import jax.numpy as jnp
from jax.experimental import pallas as pl
from jax.experimental.pallas import tpu as pltpu


def _round_up(x, m):
    return (x + m - 1) // m * m


def _trane_loss_kernel(e1a_ref, e2a_ref, rela_ref,
                       e1b_ref, e2b_ref, relb_ref,
                       out_ref, acc_ref, *,
                       gamma, d_norm, block_rows, valid_rows, need_mask):
    """Per tile: sum(relu(gamma + ||h+r-t||_p - ||h'+r'-t'||_p)), accumulated."""
    i = pl.program_id(0)

    @pl.when(i == 0)
    def _init():
        acc_ref[...] = jnp.zeros_like(acc_ref)

    f32 = jnp.float32
    pos_dis = (e1a_ref[...].astype(f32) + rela_ref[...].astype(f32)
               - e2a_ref[...].astype(f32))                          # (TB, D)
    neg_dis = (e1b_ref[...].astype(f32) + relb_ref[...].astype(f32)
               - e2b_ref[...].astype(f32))                          # (TB, D)

    if d_norm == 1:
        pos_n = jnp.sum(jnp.abs(pos_dis), axis=1, keepdims=True)    # (TB, 1)
        neg_n = jnp.sum(jnp.abs(neg_dis), axis=1, keepdims=True)
    else:  # L2
        pos_n = jnp.sqrt(jnp.sum(pos_dis * pos_dis, axis=1, keepdims=True))
        neg_n = jnp.sqrt(jnp.sum(neg_dis * neg_dis, axis=1, keepdims=True))

    per_ex = jnp.maximum(gamma + pos_n - neg_n, 0.0)                # (TB, 1)

    if need_mask:  # mask rows of the padded tail tile
        row = (i * block_rows
               + jax.lax.broadcasted_iota(jnp.int32, (block_rows, 1), 0))
        per_ex = jnp.where(row < valid_rows, per_ex, 0.0)

    acc_ref[...] += jnp.sum(per_ex, keepdims=True)                  # (1, 1)

    @pl.when(i == pl.num_programs(0) - 1)
    def _finalize():
        out_ref[...] = acc_ref[...]


def _pick_batch_tile(batch_rows, d_pad, itemsize):
    # 6 streamed inputs, each double-buffered by the Pallas pipeline.  Keep
    # the VMEM block footprint ~8 MiB so it fits the default scoped-VMEM
    # budget on every generation (v5e: 16 MiB scoped; v7x: 64 MiB total VMEM)
    # while still amortizing the ~0.35 us/step grid overhead.
    budget_bytes = 8 * 1024 * 1024
    per_row = 6 * 2 * d_pad * itemsize
    tb = budget_bytes // per_row
    tb = max(8, min(tb, 2048, _round_up(batch_rows, 8)))
    tb -= tb % 8
    return max(8, int(tb))


class TranE:
    """JAX/Pallas port of the PyTorch TranE module (forward pass)."""

    def __init__(self, entity_num, relation_num, dim=100, d_norm=1, gamma=1.0,
                 key=None, embed_dtype=jnp.bfloat16):
        if key is None:
            key = jax.random.PRNGKey(0)
        k_ent, k_rel = jax.random.split(key)
        bound = 6.0 / math.sqrt(dim)
        ent = jax.random.uniform(k_ent, (entity_num, dim), jnp.float32,
                                 minval=-bound, maxval=bound)
        rel = jax.random.uniform(k_rel, (relation_num, dim), jnp.float32,
                                 minval=-bound, maxval=bound)
        # Row-normalize both tables (as in the PyTorch __init__).
        ent = ent / jnp.linalg.norm(ent, axis=1, keepdims=True)
        rel = rel / jnp.linalg.norm(rel, axis=1, keepdims=True)

        # Pad embedding dim to a multiple of 128 (dense lanes); zero pad
        # columns contribute nothing to the L1/L2 norms.
        self.dim = dim
        self.d_pad = _round_up(dim, 128)
        if self.d_pad != dim:
            ent = jnp.pad(ent, ((0, 0), (0, self.d_pad - dim)))
            rel = jnp.pad(rel, ((0, 0), (0, self.d_pad - dim)))

        # Store tables in bf16; kernel upcasts to f32 for all math.
        self.embed_dtype = embed_dtype
        self.entity_embedding = ent.astype(embed_dtype)
        self.relation_embedding = rel.astype(embed_dtype)

        self.d_norm = int(d_norm)
        self.gamma = float(gamma)
        self.entity_num = entity_num
        self.relation_num = relation_num

    def __call__(self, pos_head, pos_tail, pos_relation,
                 neg_head, neg_tail, neg_relation, *, max_tile_rows=None):
        b = pos_head.shape[0]
        d = self.d_pad
        itemsize = jnp.dtype(self.embed_dtype).itemsize

        tb = _pick_batch_tile(b, d, itemsize)
        if max_tile_rows is not None:
            tb = min(tb, max(8, max_tile_rows - max_tile_rows % 8))
        b_pad = _round_up(b, tb)
        num_tiles = b_pad // tb

        def pad_idx(idx):
            return jnp.pad(idx.astype(jnp.int32), (0, b_pad - b))

        # Embedding gather (nn.Embedding forward) — JAX glue.
        # TODO(synk): fuse this gather into the kernel (scalar prefetch +
        # in-kernel block gather) to avoid materializing six (B, D) streams.
        e1_a = jnp.take(self.entity_embedding, pad_idx(pos_head), axis=0)
        e2_a = jnp.take(self.entity_embedding, pad_idx(pos_tail), axis=0)
        rel_a = jnp.take(self.relation_embedding, pad_idx(pos_relation), axis=0)
        e1_b = jnp.take(self.entity_embedding, pad_idx(neg_head), axis=0)
        e2_b = jnp.take(self.entity_embedding, pad_idx(neg_tail), axis=0)
        rel_b = jnp.take(self.relation_embedding, pad_idx(neg_relation), axis=0)

        kernel = functools.partial(
            _trane_loss_kernel,
            gamma=self.gamma, d_norm=self.d_norm,
            block_rows=tb, valid_rows=b, need_mask=(b_pad != b))

        tile_spec = pl.BlockSpec((tb, d), lambda i: (i, 0))
        out = pl.pallas_call(
            kernel,
            out_shape=jax.ShapeDtypeStruct((1, 1), jnp.float32),
            grid_spec=pltpu.PrefetchScalarGridSpec(
                num_scalar_prefetch=0,
                grid=(num_tiles,),
                in_specs=[tile_spec] * 6,
                out_specs=pl.BlockSpec((1, 1), lambda i: (0, 0)),
                scratch_shapes=[pltpu.VMEM((1, 1), jnp.float32)]),
            compiler_params=pltpu.CompilerParams(
                dimension_semantics=("arbitrary",)),
        )(e1_a, e2_a, rel_a, e1_b, e2_b, rel_b)
        return out[0, 0]


def _reference_loss(model, ph, pt, pr, nh, nt, nr):
    ent = model.entity_embedding.astype(jnp.float32)
    rel = model.relation_embedding.astype(jnp.float32)
    pos = ent[ph] + rel[pr] - ent[pt]
    neg = ent[nh] + rel[nr] - ent[nt]
    if model.d_norm == 1:
        pn = jnp.sum(jnp.abs(pos), axis=1)
        nn_ = jnp.sum(jnp.abs(neg), axis=1)
    else:
        pn = jnp.sqrt(jnp.sum(pos * pos, axis=1))
        nn_ = jnp.sqrt(jnp.sum(neg * neg, axis=1))
    return jnp.sum(jnp.maximum(model.gamma + pn - nn_, 0.0))


def _make_indices(key, batch, entity_num, relation_num):
    k = jax.random.split(key, 6)
    return (jax.random.randint(k[0], (batch,), 0, entity_num, jnp.int32),
            jax.random.randint(k[1], (batch,), 0, entity_num, jnp.int32),
            jax.random.randint(k[2], (batch,), 0, relation_num, jnp.int32),
            jax.random.randint(k[3], (batch,), 0, entity_num, jnp.int32),
            jax.random.randint(k[4], (batch,), 0, entity_num, jnp.int32),
            jax.random.randint(k[5], (batch,), 0, relation_num, jnp.int32))


if __name__ == "__main__":
    entity_num, relation_num, dim = 16, 4, 128

    # Case 1/2: small batch, single tile, both L1 and L2 norms.
    idx_small = _make_indices(jax.random.PRNGKey(0), 8, entity_num, relation_num)
    for d_norm in (1, 2):
        model = TranE(entity_num, relation_num, dim=dim, d_norm=d_norm,
                      gamma=1.0, key=jax.random.PRNGKey(0))
        loss = jax.block_until_ready(model(*idx_small))
        ref = _reference_loss(model, *idx_small)
        assert jnp.allclose(loss, ref, rtol=1e-4, atol=1e-4), (d_norm, loss, ref)

    # Case 3: multi-tile grid with a masked (padded) tail tile + accumulator.
    model = TranE(entity_num, relation_num, dim=dim, d_norm=1, gamma=1.0,
                  key=jax.random.PRNGKey(0))
    idx_big = _make_indices(jax.random.PRNGKey(1), 40, entity_num, relation_num)
    loss = jax.block_until_ready(model(*idx_big, max_tile_rows=16))
    ref = _reference_loss(model, *idx_big)
    assert jnp.allclose(loss, ref, rtol=1e-4, atol=1e-4), (loss, ref)

    print("KERNEL_OK")
</pallas_src>

<mosaic_0001>
module attributes {stable_mosaic.version = 11 : i64} {
  func.func @_trane_loss_kernel(%arg0: i32, %arg1: memref<8x128xbf16, #tpu.memory_space<vmem>>, %arg2: memref<8x128xbf16, #tpu.memory_space<vmem>>, %arg3: memref<8x128xbf16, #tpu.memory_space<vmem>>, %arg4: memref<8x128xbf16, #tpu.memory_space<vmem>>, %arg5: memref<8x128xbf16, #tpu.memory_space<vmem>>, %arg6: memref<8x128xbf16, #tpu.memory_space<vmem>>, %arg7: memref<1x1xf32, #tpu.memory_space<vmem>>, %arg8: memref<1x1xf32, #tpu.memory_space<vmem>>) attributes {dimension_semantics = [#tpu.dimension_semantics<arbitrary>], iteration_bounds = array<i64: 1>, scalar_prefetch = 0 : i64, scratch_operands = 1 : i64, tpu.core_type = #tpu.core_type<tc>, window_params = [{transform_indices = @transform_0, window_bounds = array<i64: 8, 128>}, {transform_indices = @transform_1, window_bounds = array<i64: 8, 128>}, {transform_indices = @transform_2, window_bounds = array<i64: 8, 128>}, {transform_indices = @transform_3, window_bounds = array<i64: 8, 128>}, {transform_indices = @transform_4, window_bounds = array<i64: 8, 128>}, {transform_indices = @transform_5, window_bounds = array<i64: 8, 128>}, {pipeline_mode = #tpu.pipeline_mode<synchronous>, transform_indices = @transform_6, window_bounds = array<i64: 1, 1>}]} {
    %c0_i32 = arith.constant 0 : i32
    %0 = arith.cmpi eq, %arg0, %c0_i32 : i32
    %1 = arith.extui %0 : i1 to i32
    %c0_i32_0 = arith.constant 0 : i32
    %2 = arith.cmpi ne, %1, %c0_i32_0 : i32
    scf.if %2 {
      %cst_22 = arith.constant 0.000000e+00 : f32
      %41 = vector.broadcast %cst_22 : f32 to vector<1x1xf32>
      %c0_23 = arith.constant 0 : index
      %c0_24 = arith.constant 0 : index
      %42 = vector.load %arg8[%c0_23, %c0_24] : memref<1x1xf32, #tpu.memory_space<vmem>>, vector<1x1xf32>
      tpu.vector_store %arg8[%c0_23, %c0_24], %41 {strides = array<i32>} : memref<1x1xf32, #tpu.memory_space<vmem>>, vector<1x1xf32>,
    } else {
    }
    %c0 = arith.constant 0 : index
    %c0_1 = arith.constant 0 : index
    %3 = vector.load %arg1[%c0, %c0_1] : memref<8x128xbf16, #tpu.memory_space<vmem>>, vector<8x128xbf16>
    %4 = arith.extf %3 : vector<8x128xbf16> to vector<8x128xf32>
    %c0_2 = arith.constant 0 : index
    %c0_3 = arith.constant 0 : index
    %5 = vector.load %arg3[%c0_2, %c0_3] : memref<8x128xbf16, #tpu.memory_space<vmem>>, vector<8x128xbf16>
    %6 = arith.extf %5 : vector<8x128xbf16> to vector<8x128xf32>
    %7 = arith.addf %4, %6 : vector<8x128xf32>
    %c0_4 = arith.constant 0 : index
    %c0_5 = arith.constant 0 : index
    %8 = vector.load %arg2[%c0_4, %c0_5] : memref<8x128xbf16, #tpu.memory_space<vmem>>, vector<8x128xbf16>
    %9 = arith.extf %8 : vector<8x128xbf16> to vector<8x128xf32>
    %10 = arith.subf %7, %9 : vector<8x128xf32>
    %c0_6 = arith.constant 0 : index
    %c0_7 = arith.constant 0 : index
    %11 = vector.load %arg4[%c0_6, %c0_7] : memref<8x128xbf16, #tpu.memory_space<vmem>>, vector<8x128xbf16>
    %12 = arith.extf %11 : vector<8x128xbf16> to vector<8x128xf32>
    %c0_8 = arith.constant 0 : index
    %c0_9 = arith.constant 0 : index
    %13 = vector.load %arg6[%c0_8, %c0_9] : memref<8x128xbf16, #tpu.memory_space<vmem>>, vector<8x128xbf16>
    %14 = arith.extf %13 : vector<8x128xbf16> to vector<8x128xf32>
    %15 = arith.addf %12, %14 : vector<8x128xf32>
    %c0_10 = arith.constant 0 : index
    %c0_11 = arith.constant 0 : index
    %16 = vector.load %arg5[%c0_10, %c0_11] : memref<8x128xbf16, #tpu.memory_space<vmem>>, vector<8x128xbf16>
    %17 = arith.extf %16 : vector<8x128xbf16> to vector<8x128xf32>
    %18 = arith.subf %15, %17 : vector<8x128xf32>
    %19 = math.absf %10 : vector<8x128xf32>
    %cst = arith.constant dense<0.000000e+00> : vector<8xf32>
    %20 = vector.multi_reduction <add>, %19, %cst [1] : vector<8x128xf32> to vector<8xf32>
    %21 = vector.shape_cast %20 : vector<8xf32> to vector<8x1xf32>
    %22 = math.absf %18 : vector<8x128xf32>
    %cst_12 = arith.constant dense<0.000000e+00> : vector<8xf32>
    %23 = vector.multi_reduction <add>, %22, %cst_12 [1] : vector<8x128xf32> to vector<8xf32>
    %24 = vector.shape_cast %23 : vector<8xf32> to vector<8x1xf32>
    %cst_13 = arith.constant 1.000000e+00 : f32
    %25 = vector.broadcast %cst_13 : f32 to vector<8x1xf32>
    %26 = arith.addf %25, %21 : vector<8x1xf32>
    %27 = arith.subf %26, %24 : vector<8x1xf32>
    %cst_14 = arith.constant 0.000000e+00 : f32
    %28 = vector.broadcast %cst_14 : f32 to vector<8x1xf32>
    %29 = arith.maximumf %27, %28 : vector<8x1xf32>
    %c0_15 = arith.constant 0 : index
    %c0_16 = arith.constant 0 : index
    %30 = vector.load %arg8[%c0_15, %c0_16] : memref<1x1xf32, #tpu.memory_space<vmem>>, vector<1x1xf32>
    %31 = vector.shape_cast %29 : vector<8x1xf32> to vector<1x8x1xf32>
    %cst_17 = arith.constant dense<0.000000e+00> : vector<1xf32>
    %32 = vector.multi_reduction <add>, %31, %cst_17 [1, 2] : vector<1x8x1xf32> to vector<1xf32>
    %33 = vector.shape_cast %32 : vector<1xf32> to vector<1x1x1xf32>
    %34 = vector.extract %33[0, 0, 0] : f32 from vector<1x1x1xf32>
    %35 = vector.broadcast %34 : f32 to vector<1x1xf32>
    %36 = arith.addf %30, %35 : vector<1x1xf32>
    %c0_18 = arith.constant 0 : index
    %c0_19 = arith.constant 0 : index
    %37 = vector.load %arg8[%c0_18, %c0_19] : memref<1x1xf32, #tpu.memory_space<vmem>>, vector<1x1xf32>
    tpu.vector_store %arg8[%c0_18, %c0_19], %36 {strides = array<i32>} : memref<1x1xf32, #tpu.memory_space<vmem>>, vector<1x1xf32>,
    %c0_i32_20 = arith.constant 0 : i32
    %38 = arith.cmpi eq, %arg0, %c0_i32_20 : i32
    %39 = arith.extui %38 : i1 to i32
    %c0_i32_21 = arith.constant 0 : i32
    %40 = arith.cmpi ne, %39, %c0_i32_21 : i32
    scf.if %40 {
      %c0_22 = arith.constant 0 : index
      %c0_23 = arith.constant 0 : index
      %41 = vector.load %arg8[%c0_22, %c0_23] : memref<1x1xf32, #tpu.memory_space<vmem>>, vector<1x1xf32>
      %c0_24 = arith.constant 0 : index
      %c0_25 = arith.constant 0 : index
      %42 = vector.load %arg7[%c0_24, %c0_25] : memref<1x1xf32, #tpu.memory_space<vmem>>, vector<1x1xf32>
      tpu.vector_store %arg7[%c0_24, %c0_25], %41 {strides = array<i32>} : memref<1x1xf32, #tpu.memory_space<vmem>>, vector<1x1xf32>,
    } else {
    }
    return
  }
  func.func @transform_0(%arg0: i32) -> (i32, i32) {
    %c0_i32 = arith.constant 0 : i32
    %c0_i32_0 = arith.constant 0 : i32
    return %arg0, %c0_i32 : i32, i32
  }
  func.func @transform_1(%arg0: i32) -> (i32, i32) {
    %c0_i32 = arith.constant 0 : i32
    %c0_i32_0 = arith.constant 0 : i32
    return %arg0, %c0_i32 : i32, i32
  }
  func.func @transform_2(%arg0: i32) -> (i32, i32) {
    %c0_i32 = arith.constant 0 : i32
    %c0_i32_0 = arith.constant 0 : i32
    return %arg0, %c0_i32 : i32, i32
  }
  func.func @transform_3(%arg0: i32) -> (i32, i32) {
    %c0_i32 = arith.constant 0 : i32
    %c0_i32_0 = arith.constant 0 : i32
    return %arg0, %c0_i32 : i32, i32
  }
  func.func @transform_4(%arg0: i32) -> (i32, i32) {
    %c0_i32 = arith.constant 0 : i32
    %c0_i32_0 = arith.constant 0 : i32
    return %arg0, %c0_i32 : i32, i32
  }
  func.func @transform_5(%arg0: i32) -> (i32, i32) {
    %c0_i32 = arith.constant 0 : i32
    %c0_i32_0 = arith.constant 0 : i32
    return %arg0, %c0_i32 : i32, i32
  }
  func.func @transform_6(%arg0: i32) -> (i32, i32) {
    %c0_i32 = arith.constant 0 : i32
    %c0_i32_0 = arith.constant 0 : i32
    %c0_i32_1 = arith.constant 0 : i32
    return %c0_i32, %c0_i32_0 : i32, i32
  }
}

</mosaic_0001>

<bundles_post_ra>
// kernel: tpu_custom_call.1
= control target key start
LH: loop header
LB: loop body
LE: loop exit
PB: predicated region body
PF: predicated region fallthrough
CT: control target
= control target key end

     0   :  { %11 = vsyncpa [#allocation4], 0  ;;  %s321_s0 = inlined_call_operand.hbm [shape: bf16[8,128], index: 0, kind: input, shape index: {}]   ;;  %s322_s1 = inlined_call_operand.hbm [shape: bf16[8,128], index: 1, kind: input, shape index: {}]   ;;  %s323_s2 = inlined_call_operand.hbm [shape: bf16[8,128], index: 2, kind: input, shape index: {}]   ;;  %s324_s3 = inlined_call_operand.vmem [shape: bf16[8,128], index: 3, kind: input, shape index: {}]   ;;  %s325_s4 = inlined_call_operand.hbm [shape: bf16[8,128], index: 4, kind: input, shape index: {}]   ;;  %s326_s5 = inlined_call_operand.vmem [shape: bf16[8,128], index: 5, kind: input, shape index: {}]   ;;  %s327_s6 = inlined_call_operand.hbm [shape: f32[1,1], index: 6, kind: output, shape index: {}]  }
   0x1   :  { %12 = vsyncpa [#allocation7], 0 }
   0x2   :  { %13 = vsyncpa [#allocation10], 0 }
   0x3   :  { %14 = vsyncpa [#allocation5], 0  ;;  %s256_s21 = smov [#allocation6]   ;;  %s257_s23 = smov [#allocation3]  }
   0x4   :  { %s31_s22 = sshll.u32 %s256_s21, 4  ;;  %s21_s24 = sshll.u32 %s257_s23, 4  ;;  %s32_s22 = int_to_ptr.vmem [resolvable:$true] %s31_s22  ;;  %s22_s24 = int_to_ptr.vmem [resolvable:$true] %s21_s24 }
   0x5   :  { %s156_s25 = scalar_lea.vmem %s32_s22, 64  ;;  %p161_p1 = scmp.lt.s32.totalorder %s32_s22, %s32_s22 }
   0x6   :  { %p157_p0 = scmp.ne.s32.totalorder %s32_s22, %s156_s25  ;;  %p162_p2 = scmp.lt.s32.totalorder %s156_s25, %s156_s25 }
   0x8   :  { %p163_p3 = por %p162_p2, %p161_p1 }
   0xa   :  { %p164_p4 = pnand %p163_p3, %p157_p0 }
   0xc   :  { %167 = shalt.err (!%p164_p4)
}
   0xd   :  { %34 = dma.hbm_to_vmem [thread:$0]  %s322_s1, 64, %s32_s22, [#allocation7]  }
   0xe   :  { %s176_s28 = scalar_lea.vmem %s22_s24, 64  ;;  %p181_p6 = scmp.lt.s32.totalorder %s22_s24, %s22_s24 }
   0xf   :  { %p177_p5 = scmp.ne.s32.totalorder %s22_s24, %s176_s28  ;;  %p182_p7 = scmp.lt.s32.totalorder %s176_s28, %s176_s28 }
  0x11   :  { %p183_p8 = por %p182_p7, %p181_p6 }
  0x13   :  { %p184_p9 = pnand %p183_p8, %p177_p5 }
  0x15   :  { %187 = shalt.err (!%p184_p9)
}
  0x16   :  { %24 = dma.hbm_to_vmem [thread:$0]  %s321_s0, 64, %s22_s24, [#allocation4]  }
  0x17   :  { %s258_s7 = smov [#allocation8]   ;;  %s259_s9 = smov [#allocation9]  }
  0x18   :  { %s41_s8 = sshll.u32 %s258_s7, 4  ;;  %s53_s10 = sshll.u32 %s259_s9, 4  ;;  %s42_s8 = int_to_ptr.vmem [resolvable:$true] %s41_s8  ;;  %s54_s10 = int_to_ptr.vmem [resolvable:$true] %s53_s10 }
  0x19   :  { %s196_s11 = scalar_lea.vmem %s42_s8, 64  ;;  %p201_p11 = scmp.lt.s32.totalorder %s42_s8, %s42_s8 }
  0x1a   :  { %p197_p10 = scmp.ne.s32.totalorder %s42_s8, %s196_s11  ;;  %p202_p12 = scmp.lt.s32.totalorder %s196_s11, %s196_s11 }
  0x1c   :  { %p203_p13 = por %p202_p12, %p201_p11 }
  0x1e   :  { %p204_p0 = pnand %p203_p13, %p197_p10 }
  0x20   :  { %207 = shalt.err (!%p204_p0)
}
  0x21   :  { %44 = dma.hbm_to_vmem [thread:$0]  %s323_s2, 64, %s42_s8, [#allocation7]  }
  0x22   :  { %s216_s13 = scalar_lea.vmem %s54_s10, 64  ;;  %p221_p2 = scmp.lt.s32.totalorder %s54_s10, %s54_s10 }
  0x23   :  { %p217_p1 = scmp.ne.s32.totalorder %s54_s10, %s216_s13  ;;  %p222_p3 = scmp.lt.s32.totalorder %s216_s13, %s216_s13 }
  0x25   :  { %p223_p4 = por %p222_p3, %p221_p2 }
  0x27   :  { %p224_p5 = pnand %p223_p4, %p217_p1 }
  0x29   :  { %227 = shalt.err (!%p224_p5)
}
  0x2a   :  { %56 = dma.hbm_to_vmem [thread:$0]  %s325_s4, 64, %s54_s10, [#allocation10]  }
  0x2b   :  { %248 = dma.done.wait [#allocation4], 64  }
  0x2c   :  { %249 = vsyncadd [#allocation4], 4294967232 }
  0x2d   :  { %250 = dma.done.wait [#allocation7], 128  }
  0x2e   :  { %251 = vsyncadd [#allocation7], 4294967168 }
  0x2f   :  { %252 = dma.done.wait [#allocation10], 64  }
  0x30   :  { %253 = vsyncadd [#allocation10], 4294967232  ;;  %v77_v0 = vld [vmem:[#allocation3] sm:$0xf]  ;;  %v79_v1 = vld [vmem:[#allocation8] sm:$0xf] }
  0x31   :  { %v82_v2 = vld [vmem:[#allocation6] sm:$0xf]  ;;  %v78_v3 = vunpack.c.l.bf16 %v77_v0  ;;  %v80_v4 = vunpack.c.l.bf16 %v79_v1  ;;  %v85_v6 = vld [vmem:[%s324_s3] sm:$0xf]  ;;  %v90_v8 = vld [vmem:[#allocation9] sm:$0xf] }
  0x32   :  { %v83_v5 = vunpack.c.l.bf16 %v82_v2  ;;  %v87_v7 = vld [vmem:[%s326_s5] sm:$0xf]  ;;  %v86_v9 = vunpack.c.l.bf16 %v85_v6  ;;  %v91_v11 = vunpack.c.l.bf16 %v90_v8  ;;  %vm103_vm0 = vcmask 7168   ;;  %s261_s4 = smov [#allocation11]  }
  0x33   :  { %v88_v10 = vunpack.c.l.bf16 %v87_v7  ;;  %v81_v12 = vadd.f32 %v80_v4, %v78_v3  ;;  %vm75_vm1 = vcmask 0   ;;  %v260_v24 = vmov 0.0   ;;  %s129_s5 = sshll.u32 %s261_s4, 4  ;;  %s130_s5 = int_to_ptr.vmem [resolvable:$true] %s129_s5 }
  0x34   :  { %76 = vst.msk [vmem:[#allocation2] sm:$0x1] %vm75_vm1, %v260_v24  ;;  %s228_s18 = scalar_lea.vmem %s130_s5, 16  ;;  %s232_s19 = scalar_lea.vmem %s130_s5, 32 }
  0x35   :  { %v89_v13 = vadd.f32 %v88_v10, %v86_v9  ;;  %v84_v14 = vsub.f32 %v81_v12, %v83_v5  ;;  %p229_p6 = scmp.ne.s32.totalorder %s130_s5, %s228_s18  ;;  %p233_p7 = scmp.lt.s32.totalorder %s130_s5, %s130_s5 }
  0x36   :  { %p234_p8 = scmp.lt.s32.totalorder %s232_s19, %s228_s18 }
  0x37   :  { %v92_v15 = vsub.f32 %v89_v13, %v91_v11  ;;  %v93_v16 = vand.u32 2147483647, %v84_v14 }
  0x38   :  { %p235_p9 = por %p234_p8, %p233_p7 }
  0x39   :  { %94 = vadd.xlane.f32.xlu0 %v93_v16  ;;  %v96_v17 = vand.u32 2147483647, %v92_v15 }
  0x3a   :  { %p236_p10 = pnand %p235_p9, %p229_p6 }
  0x3b   :  { %v102_v32 = vld [vmem:[#allocation2] sm:$0x1] }
  0x3d   :  { %97 = vadd.xlane.f32.xlu0 %v96_v17 }
  0xc2   :  { %v95_v18 = vpop.xlane.xlu0 %94 }
  0xc3   :  { %v99_v19 = vadd.f32 1.0, %v95_v18 }
  0xc6   :  { %v98_v20 = vpop.xlane.xlu0 %97 }
  0xc7   :  { %v100_v21 = vsub.f32 %v99_v19, %v98_v20 }
  0xc9   :  { %v101_v22 = vmax.f32 %v100_v21, 0.0 }
  0xcb   :  { %v104_v23 = vsel %vm103_vm0, %v101_v22, 0.0 }
  0xcc   :  { %105 = vadd.xlane.f32.xlu1 %v104_v23 }
 0x155   :  { %v106_v25 = vpop.xlane.xlu1 %105 }
 0x156   :  { %v107_v26 = vrot.slane %v106_v25, 4 }
 0x158   :  { %v108_v27 = vadd.f32 %v107_v26, %v106_v25 }
 0x15a   :  { %v109_v28 = vrot.slane %v108_v27, 2 }
 0x15c   :  { %v110_v29 = vadd.f32 %v109_v28, %v108_v27 }
 0x15e   :  { %v111_v30 = vrot.slane %v110_v29, 1 }
 0x160   :  { %v112_v31 = vadd.f32 %v111_v30, %v110_v29 }
 0x162   :  { %140 = vpush %v112_v31 }
 0x193   :  { %s141_s3 = spop %140 }
 0x194   :  { %v114_v33 = vstv %s141_s3 }
 0x195   :  { %v115_v34 = vadd.f32 %v114_v33, %v102_v32 }
 0x197   :  { %117 = vst.msk [vmem:[#allocation2] sm:$0x1] %vm75_vm1, %v115_v34 }
 0x19e   :  { %v121_v35 = vld [vmem:[#allocation2] sm:$0x1] }
 0x19f   :  { %122 = vst.msk [vmem:[#allocation11] sm:$0x1] %vm75_vm1, %v121_v35 }
 0x1a0   :  { %239 = shalt.err (!%p236_p10)
}
 0x1a1   :  { %132 = dma.vmem_to_hbm [thread:$0]  %s130_s5, 16, %s327_s6, [#allocation5]  }
 0x1a2   :  { %254 = dma.done.wait [#allocation5], 16  }
 0x1a3   :  { %255 = vsyncadd [#allocation5], 4294967280 }
 0x1a4   :  { %136 = vsyncpa [#allocation4], 1 }
 0x1a5   :  { %137 = vsyncpa [#allocation7], 1 }
 0x1a6   :  { %138 = vsyncpa [#allocation10], 1 }
 0x1a7   :  { %139 = vsyncpa [#allocation5], 1 }

</bundles_post_ra>
